<compile_context>
chip_gen: v7x
topology: tpu7x:2x2x1
jax: 0.10.0
libtpu: 0.0.40
codegen_flags: <defaults>
</compile_context>

<pallas_src>
from functools import partial

import jax
import jax.numpy as jnp
from jax.experimental import pallas as pl
from jax.experimental.pallas import tpu as pltpu


def _round_up(n, m):
    return ((n + m - 1) // m) * m


def _cdiv(a, b):
    return -(-a // b)


# ----------------------------------------------------------------------------
# Kernel: feature-major fused MLP
#   h0^T = relu(W_in_aug^T @ X_aug^T)            (128, TB)   (bias folded in)
#   h1^T = relu(W1^T @ h0^T + b1)                (128, TB)
#   q^T  = w2_row @ h1^T + b2                    (1,   TB)
# ----------------------------------------------------------------------------
def ddpg_critic_kernel(xT_ref, w_in_ref, w1_ref, b1_ref, w2_ref, b2_ref, qT_ref):
    cdt = w1_ref.dtype  # compute dtype of the MXU operands (f32 or bf16)

    h0 = jnp.dot(w_in_ref[...], xT_ref[...],
                 preferred_element_type=jnp.float32)             # (H, TB)
    h0 = jnp.maximum(h0, 0.0)

    h1 = jnp.dot(w1_ref[...], h0.astype(cdt),
                 preferred_element_type=jnp.float32) + b1_ref[...]
    h1 = jnp.maximum(h1, 0.0)                                    # (H, TB)

    q = jnp.dot(w2_ref[...], h1.astype(cdt),
                preferred_element_type=jnp.float32) + b2_ref[0]  # (1, TB)
    qT_ref[...] = q.astype(qT_ref.dtype)


# ----------------------------------------------------------------------------
# One-time parameter fusion (done at init / param-load time, NOT per forward).
# ----------------------------------------------------------------------------
def prepare_fused_params(p, *, use_bf16=False):
    S, hs = p["ws"].shape
    A, ha = p["wa"].shape
    hidden = hs + ha

    # Transposed block-diagonal input weight with the bias as an extra column
    # (applied to an augmented ones-row of X^T).  Exact in f32.
    w_inT = jnp.zeros((hidden, S + A), jnp.float32)
    w_inT = w_inT.at[:hs, :S].set(p["ws"].T)
    w_inT = w_inT.at[hs:, S:].set(p["wa"].T)
    b_in = jnp.concatenate([p["bs"], p["ba"]])
    w_in_augT = jnp.concatenate([w_inT, b_in[:, None]], axis=1)  # (H, S+A+1)

    wdt = jnp.bfloat16 if use_bf16 else jnp.float32
    return dict(
        w_in_augT=w_in_augT.astype(wdt),       # (H, S+A+1)
        w1T=p["w1"].T.astype(wdt),             # (H, H)
        b1_col=p["b1"][:, None].astype(jnp.float32),   # (H, 1)
        w2_row=p["w2"].T.astype(wdt),          # (1, H)
        b2=p["b2"].reshape(1).astype(jnp.float32),     # (1,)  -> SMEM scalar
    )


# ----------------------------------------------------------------------------
# Forward wrapper.  Jitted so the transpose/concat/pad/slice fuse with the
# pallas_call instead of costing extra HBM round-trips.
# ----------------------------------------------------------------------------
@partial(jax.jit, static_argnames=("max_batch_tile",))
def ddpg_critic_forward(state, action, fused, *, max_batch_tile=2048):
    """state: (B, S) f32, action: (B, A) f32 -> q: (B, 1) f32."""
    B, S = state.shape
    A = action.shape[1]
    hidden = fused["w1T"].shape[0]          # 128
    cdt = fused["w1T"].dtype
    F = S + A + 1                           # features + ones-row (bias fold)

    # ---- batch tiling: lane-dense tiles (multiples of 128), sized to B ----
    MIN_TB = 128
    nt = max(1, _cdiv(B, max_batch_tile))
    if B >= 2 * MIN_TB:
        nt = max(nt, 2)                     # v7x: give both TensorCores work
    if nt > 1 and nt % 2:
        nt += 1                             # v7x: even split across 2 TCs
    TB = _round_up(_cdiv(B, nt), MIN_TB)
    B_pad = TB * nt

    # ---- feature-major input: [state^T ; action^T ; ones] padded on lanes --
    xT = jnp.concatenate(
        [state.T, action.T, jnp.ones((1, B), jnp.float32)], axis=0)  # (F, B)
    if B_pad != B:
        xT = jnp.pad(xT, ((0, 0), (0, B_pad - B)))
    xT = xT.astype(cdt)

    # ---- resource hints -----------------------------------------------------
    itm = jnp.dtype(cdt).itemsize
    weight_bytes = (fused["w_in_augT"].size * itm + fused["w1T"].size * itm
                    + fused["w2_row"].size * itm + fused["b1_col"].size * 4 + 4)
    tile_bytes = F * TB * itm + TB * 4                 # per-step input + output
    work_bytes = 2 * tile_bytes + weight_bytes + 2 * hidden * TB * 4  # + h0,h1
    vmem_limit = min(96 * 1024 * 1024, max(4 * 1024 * 1024, 4 * work_bytes))

    flops = 2 * B_pad * (F * hidden + hidden * hidden + hidden)
    bytes_accessed = xT.size * itm + B_pad * 4 + weight_bytes
    cost = pl.CostEstimate(flops=flops, transcendentals=0,
                           bytes_accessed=bytes_accessed)

    const = lambda i: (0, 0)                # weights: VMEM-resident, DMA'd once
    qT = pl.pallas_call(
        ddpg_critic_kernel,
        out_shape=jax.ShapeDtypeStruct((1, B_pad), jnp.float32),
        grid=(nt,),
        in_specs=[
            pl.BlockSpec((F, TB), lambda i: (0, i)),          # X_aug^T tile
            pl.BlockSpec((hidden, F), const),                 # W_in_aug^T
            pl.BlockSpec((hidden, hidden), const),            # W1^T
            pl.BlockSpec((hidden, 1), const),                 # b1 column
            pl.BlockSpec((1, hidden), const),                 # w2 row
            pl.BlockSpec(memory_space=pltpu.MemorySpace.SMEM),  # b2 scalar
        ],
        out_specs=pl.BlockSpec((1, TB), lambda i: (0, i)),    # lane-dense q^T
        compiler_params=pltpu.CompilerParams(
            dimension_semantics=("parallel",),
            vmem_limit_bytes=int(vmem_limit),
        ),
        cost_estimate=cost,
    )(xT, fused["w_in_augT"], fused["w1T"], fused["b1_col"],
      fused["w2_row"], fused["b2"])

    return qT[0, :B][:, None]               # (B, 1); fuses into the jit


# ----------------------------------------------------------------------------
# Parameter init + plain-JAX reference (mirrors the PyTorch module).
# ----------------------------------------------------------------------------
def init_params(key, state_dim, action_dim):
    """Weights stored as (in_features, out_features), i.e. PyTorch W.T."""
    ks = jax.random.split(key, 8)

    def lin(kw, kb, fan_in, fan_out):
        bound = 1.0 / jnp.sqrt(fan_in)
        w = jax.random.uniform(kw, (fan_in, fan_out), jnp.float32, -bound, bound)
        b = jax.random.uniform(kb, (fan_out,), jnp.float32, -bound, bound)
        return w, b

    ws, bs = lin(ks[0], ks[1], state_dim, 64)
    wa, ba = lin(ks[2], ks[3], action_dim, 64)
    w1, b1 = lin(ks[4], ks[5], 128, 128)
    w2, b2 = lin(ks[6], ks[7], 128, 1)
    return dict(ws=ws, bs=bs, wa=wa, ba=ba, w1=w1, b1=b1, w2=w2, b2=b2)


def reference_forward(state, action, p):
    xs = jax.nn.relu(state @ p["ws"] + p["bs"])
    xa = jax.nn.relu(action @ p["wa"] + p["ba"])
    x = jnp.concatenate([xs, xa], axis=1)
    h = jax.nn.relu(x @ p["w1"] + p["b1"])
    return h @ p["w2"] + p["b2"]


if __name__ == "__main__":
    key = jax.random.PRNGKey(0)
    k_state, k_action, k_params = jax.random.split(key, 3)

    batch = 2
    state_dim = 8       # stands in for len(data.columns)
    action_dim = 1      # module's action_dim

    state = jax.random.normal(k_state, (batch, state_dim), jnp.float32)
    action = jax.random.uniform(k_action, (batch, action_dim), jnp.float32,
                                minval=-1.0, maxval=1.0)
    params = init_params(k_params, state_dim, action_dim)
    fused = prepare_fused_params(params)        # hoisted, once per param load

    q = jax.block_until_ready(ddpg_critic_forward(state, action, fused))
    q_ref = reference_forward(state, action, params)
    assert q.shape == (batch, 1)
    assert jnp.allclose(q, q_ref, atol=1e-5, rtol=1e-5), (q, q_ref)

    # Multi-tile batch: exercises the grid, even-tile split and padding path.
    big = 1037
    state_b = jax.random.normal(k_state, (big, state_dim), jnp.float32)
    action_b = jax.random.uniform(k_action, (big, action_dim), jnp.float32,
                                  minval=-1.0, maxval=1.0)
    q_b = jax.block_until_ready(ddpg_critic_forward(state_b, action_b, fused))
    q_b_ref = reference_forward(state_b, action_b, params)
    assert q_b.shape == (big, 1)
    assert jnp.allclose(q_b, q_b_ref, atol=1e-4, rtol=1e-4)

    print("KERNEL_OK")
</pallas_src>

<mosaic_0001>
module attributes {stable_mosaic.version = 11 : i64} {
  func.func @ddpg_critic_kernel(%arg0: i32, %arg1: memref<10x128xf32, #tpu.memory_space<vmem>>, %arg2: memref<128x10xf32, #tpu.memory_space<vmem>>, %arg3: memref<128x128xf32, #tpu.memory_space<vmem>>, %arg4: memref<128x1xf32, #tpu.memory_space<vmem>>, %arg5: memref<1x128xf32, #tpu.memory_space<vmem>>, %arg6: memref<1xf32, #tpu.memory_space<smem>>, %arg7: memref<1x128xf32, #tpu.memory_space<vmem>>) attributes {dimension_semantics = [#tpu.dimension_semantics<parallel>], iteration_bounds = array<i64: 1>, scalar_prefetch = 0 : i64, scratch_operands = 0 : i64, tpu.core_type = #tpu.core_type<tc>, window_params = [{transform_indices = @transform_0, window_bounds = array<i64: 10, 128>}, {pipeline_mode = #tpu.pipeline_mode<synchronous>, transform_indices = @transform_1, window_bounds = array<i64: 128, 10>}, {pipeline_mode = #tpu.pipeline_mode<synchronous>, transform_indices = @transform_2, window_bounds = array<i64: 128, 128>}, {pipeline_mode = #tpu.pipeline_mode<synchronous>, transform_indices = @transform_3, window_bounds = array<i64: 128, 1>}, {pipeline_mode = #tpu.pipeline_mode<synchronous>, transform_indices = @transform_4, window_bounds = array<i64: 1, 128>}, {transform_indices = @transform_5, window_bounds = array<i64: 1>}, {transform_indices = @transform_6, window_bounds = array<i64: 1, 128>}]} {
    %c0 = arith.constant 0 : index
    %c0_0 = arith.constant 0 : index
    %0 = vector.load %arg2[%c0, %c0_0] : memref<128x10xf32, #tpu.memory_space<vmem>>, vector<128x10xf32>
    %c0_1 = arith.constant 0 : index
    %c0_2 = arith.constant 0 : index
    %1 = vector.load %arg1[%c0_1, %c0_2] : memref<10x128xf32, #tpu.memory_space<vmem>>, vector<10x128xf32>
    %cst = arith.constant dense<0.000000e+00> : vector<128x128xf32>
    %2 = tpu.matmul %0, %1, %cst {dimension_numbers = #tpu.dot_dimension_numbers<[1], [0], [0], [1], [0, 0, 1, 1], [], []>} : vector<128x10xf32>, vector<10x128xf32>, vector<128x128xf32> -> vector<128x128xf32>
    %cst_3 = arith.constant 0.000000e+00 : f32
    %3 = vector.broadcast %cst_3 : f32 to vector<128x128xf32>
    %4 = arith.maximumf %2, %3 : vector<128x128xf32>
    %c0_4 = arith.constant 0 : index
    %c0_5 = arith.constant 0 : index
    %5 = vector.load %arg3[%c0_4, %c0_5] : memref<128x128xf32, #tpu.memory_space<vmem>>, vector<128x128xf32>
    %cst_6 = arith.constant dense<0.000000e+00> : vector<128x128xf32>
    %6 = tpu.matmul %5, %4, %cst_6 {dimension_numbers = #tpu.dot_dimension_numbers<[1], [0], [0], [1], [0, 0, 1, 1], [], []>} : vector<128x128xf32>, vector<128x128xf32>, vector<128x128xf32> -> vector<128x128xf32>
    %c0_7 = arith.constant 0 : index
    %c0_8 = arith.constant 0 : index
    %7 = vector.load %arg4[%c0_7, %c0_8] : memref<128x1xf32, #tpu.memory_space<vmem>>, vector<128x1xf32>
    %8 = vector.broadcast %7 : vector<128x1xf32> to vector<128x128xf32>
    %9 = arith.addf %6, %8 : vector<128x128xf32>
    %cst_9 = arith.constant 0.000000e+00 : f32
    %10 = vector.broadcast %cst_9 : f32 to vector<128x128xf32>
    %11 = arith.maximumf %9, %10 : vector<128x128xf32>
    %c0_10 = arith.constant 0 : index
    %c0_11 = arith.constant 0 : index
    %12 = vector.load %arg5[%c0_10, %c0_11] : memref<1x128xf32, #tpu.memory_space<vmem>>, vector<1x128xf32>
    %cst_12 = arith.constant dense<0.000000e+00> : vector<1x128xf32>
    %13 = tpu.matmul %12, %11, %cst_12 {dimension_numbers = #tpu.dot_dimension_numbers<[1], [0], [0], [1], [0, 0, 1, 1], [], []>} : vector<1x128xf32>, vector<128x128xf32>, vector<1x128xf32> -> vector<1x128xf32>
    %c0_13 = arith.constant 0 : index
    %14 = memref.load %arg6[%c0_13] : memref<1xf32, #tpu.memory_space<smem>>
    %15 = vector.broadcast %14 : f32 to vector<1x128xf32>
    %16 = arith.addf %13, %15 : vector<1x128xf32>
    %c0_14 = arith.constant 0 : index
    %c0_15 = arith.constant 0 : index
    %17 = vector.load %arg7[%c0_14, %c0_15] : memref<1x128xf32, #tpu.memory_space<vmem>>, vector<1x128xf32>
    tpu.vector_store %arg7[%c0_14, %c0_15], %16 {strides = array<i32>} : memref<1x128xf32, #tpu.memory_space<vmem>>, vector<1x128xf32>,
    return
  }
  func.func @transform_0(%arg0: i32) -> (i32, i32) {
    %c0_i32 = arith.constant 0 : i32
    %c0_i32_0 = arith.constant 0 : i32
    return %c0_i32, %arg0 : i32, i32
  }
  func.func @transform_1(%arg0: i32) -> (i32, i32) {
    %c0_i32 = arith.constant 0 : i32
    %c0_i32_0 = arith.constant 0 : i32
    %c0_i32_1 = arith.constant 0 : i32
    return %c0_i32, %c0_i32_0 : i32, i32
  }
  func.func @transform_2(%arg0: i32) -> (i32, i32) {
    %c0_i32 = arith.constant 0 : i32
    %c0_i32_0 = arith.constant 0 : i32
    %c0_i32_1 = arith.constant 0 : i32
    return %c0_i32, %c0_i32_0 : i32, i32
  }
  func.func @transform_3(%arg0: i32) -> (i32, i32) {
    %c0_i32 = arith.constant 0 : i32
    %c0_i32_0 = arith.constant 0 : i32
    %c0_i32_1 = arith.constant 0 : i32
    return %c0_i32, %c0_i32_0 : i32, i32
  }
  func.func @transform_4(%arg0: i32) -> (i32, i32) {
    %c0_i32 = arith.constant 0 : i32
    %c0_i32_0 = arith.constant 0 : i32
    %c0_i32_1 = arith.constant 0 : i32
    return %c0_i32, %c0_i32_0 : i32, i32
  }
  func.func @transform_5(%arg0: i32) -> i32 {
    %c0_i32 = arith.constant 0 : i32
    %c0_i32_0 = arith.constant 0 : i32
    return %c0_i32 : i32
  }
  func.func @transform_6(%arg0: i32) -> (i32, i32) {
    %c0_i32 = arith.constant 0 : i32
    %c0_i32_0 = arith.constant 0 : i32
    return %c0_i32, %arg0 : i32, i32
  }
}

</mosaic_0001>

<bundles_post_ra>
// kernel: ddpg_critic_forward.1
= control target key start
LH: loop header
LB: loop body
LE: loop exit
PB: predicated region body
PF: predicated region fallthrough
CT: control target
= control target key end

     0   :  { %vm91_vm0 = vcmask 1041408   ;;  %vm42_vm1 = vcmask 80896   ;;  %vm879_vm2 = vmmov 1   ;;  %v880_v20 = vmov 0   ;;  %s1102_s0 = inlined_call_operand.vmem [shape: f32[10,128], index: 0, kind: input, shape index: {}]   ;;  %s1103_s1 = inlined_call_operand.vmem [shape: f32[128,10], index: 1, kind: input, shape index: {}]   ;;  %s1104_s2 = inlined_call_operand.vmem [shape: f32[128,128], index: 2, kind: input, shape index: {}]   ;;  %s1105_s3 = inlined_call_operand.vmem [shape: f32[128,1], index: 3, kind: input, shape index: {}]   ;;  %s1106_s4 = inlined_call_operand.vmem [shape: f32[1,128], index: 4, kind: input, shape index: {}]   ;;  %s1107_s5 = inlined_call_operand.<no memory space> [shape: f32[1], index: 5, kind: input, shape index: {}]   ;;  %s1108_s6 = inlined_call_operand.vmem [shape: f32[1,128], index: 6, kind: output, shape index: {}]  }
   0x1   :  { %v40_v0 = vld [vmem:[%s1102_s0] sm:$0xff]  ;;  %v41_v1 = vld [vmem:[%s1102_s0 + $0x8] sm:$0x3]  ;;  %vm811_vm3 = vmpackc.low %vm91_vm0, %vm879_vm2  ;;  %877 = vset.pattern.permute.xlu0 %v880_v20  ;;  %878 = vset.pattern.permute.xlu1 %v880_v20  ;;  %vm882_vm4 = vmmov 0  }
   0x2   :  { %v810_v2 = vpack.c.bf16 %v41_v1, %v40_v0  ;;  %v24_v3 = vld [vmem:[%s1103_s1] sm:$0xff]  ;;  %v25_v4 = vld [vmem:[%s1103_s1 + $0x8] sm:$0xff]  ;;  %v26_v5 = vld [vmem:[%s1103_s1 + $0x10] sm:$0xff] }
   0x3   :  { %695 = vmatprep.mubr.msk.f32.mxu0 %vm42_vm1, %v24_v3  ;;  %v27_v6 = vld [vmem:[%s1103_s1 + $0x18] sm:$0xff]  ;;  %v28_v7 = vld [vmem:[%s1103_s1 + $0x20] sm:$0xff]  ;;  %v29_v8 = vld [vmem:[%s1103_s1 + $0x28] sm:$0xff] }
   0x4   :  { %812 = vmatprep.subr.msk.bf16.mxu0 %vm811_vm3, %v810_v2  ;;  %v30_v9 = vld [vmem:[%s1103_s1 + $0x30] sm:$0xff]  ;;  %v31_v10 = vld [vmem:[%s1103_s1 + $0x38] sm:$0xff]  ;;  %v32_v11 = vld [vmem:[%s1103_s1 + $0x40] sm:$0xff] }
   0x5   :  { %815 = vmatpush3.bf16.msk.msra.mxu0 %vm811_vm3, %v810_v2  ;;  %v33_v12 = vld [vmem:[%s1103_s1 + $0x48] sm:$0xff]  ;;  %v34_v13 = vld [vmem:[%s1103_s1 + $0x50] sm:$0xff]  ;;  %v35_v14 = vld [vmem:[%s1103_s1 + $0x58] sm:$0xff] }
   0x6   :  { %v36_v15 = vld [vmem:[%s1103_s1 + $0x60] sm:$0xff]  ;;  %v37_v16 = vld [vmem:[%s1103_s1 + $0x68] sm:$0xff]  ;;  %v38_v17 = vld [vmem:[%s1103_s1 + $0x70] sm:$0xff] }
   0x7   :  { %v39_v18 = vld [vmem:[%s1103_s1 + $0x78] sm:$0xff]  ;;  %v256_v19 = vld [vmem:[%s1104_s2] sm:$0xff]  ;;  %v274_v22 = vld [vmem:[%s1105_s3 + $0x10] sm:$0xff] }
   0x8   :  { %696 = vmatmul.mubr.msk.f32.vlgmr.msra.gmra.mrb[0].mxu0 %vm42_vm1, %v25_v4  ;;  %751 = vmatprep.mubr.f32.mxu1 %v256_v19  ;;  %v272_v21 = vld [vmem:[%s1105_s3] sm:$0xff]  ;;  %v273_v23 = vld [vmem:[%s1105_s3 + $0x8] sm:$0xff]  ;;  %v275_v24 = vld [vmem:[%s1105_s3 + $0x18] sm:$0xff] }
   0x9   :  { %698 = vmatprep.mubr.msk.f32.mxu0 %vm42_vm1, %v26_v5  ;;  %290 = vperm.xlu0 %877, %v272_v21   ;;  %v276_v25 = vld [vmem:[%s1105_s3 + $0x20] sm:$0xff]  ;;  %v277_v26 = vld [vmem:[%s1105_s3 + $0x28] sm:$0xff]  ;;  %v278_v27 = vld [vmem:[%s1105_s3 + $0x30] sm:$0xff] }
   0xa   :  { %300 = vperm.xlu1 %878, %v274_v22   ;;  %v279_v28 = vld [vmem:[%s1105_s3 + $0x38] sm:$0xff]  ;;  %v280_v29 = vld [vmem:[%s1105_s3 + $0x40] sm:$0xff]  ;;  %v281_v30 = vld [vmem:[%s1105_s3 + $0x48] sm:$0xff] }
   0xb   :  { %v282_v31 = vld [vmem:[%s1105_s3 + $0x50] sm:$0xff]  ;;  %v283_v32 = vld [vmem:[%s1105_s3 + $0x58] sm:$0xff]  ;;  %v284_v33 = vld [vmem:[%s1105_s3 + $0x60] sm:$0xff] }
   0xc   :  { %699 = vmatmul.mubr.msk.f32.gmra.mrb[2].mxu0 %vm42_vm1, %v27_v6  ;;  %v285_v34 = vld [vmem:[%s1105_s3 + $0x68] sm:$0xff]  ;;  %v286_v35 = vld [vmem:[%s1105_s3 + $0x70] sm:$0xff]  ;;  %v287_v36 = vld [vmem:[%s1105_s3 + $0x78] sm:$0xff] }
   0xd   :  { %701 = vmatprep.mubr.msk.f32.mxu0 %vm42_vm1, %v28_v7  ;;  %295 = vperm.xlu0 %877, %v273_v23   ;;  %v263_v19 = vld [vmem:[%s1104_s2 + $0x38] sm:$0xff]  ;;  %v264_v20 = vld [vmem:[%s1104_s2 + $0x40] sm:$0xff]  ;;  %v265_v21 = vld [vmem:[%s1104_s2 + $0x48] sm:$0xff] }
   0xe   :  { %305 = vperm.xlu1 %878, %v275_v24   ;;  %v266_v22 = vld [vmem:[%s1104_s2 + $0x50] sm:$0xff]  ;;  %v267_v23 = vld [vmem:[%s1104_s2 + $0x58] sm:$0xff]  ;;  %v268_v24 = vld [vmem:[%s1104_s2 + $0x60] sm:$0xff] }
  0x10   :  { %702 = vmatmul.mubr.msk.f32.gmra.mrb[4].mxu0 %vm42_vm1, %v29_v8 }
  0x11   :  { %704 = vmatprep.mubr.msk.f32.mxu0 %vm42_vm1, %v30_v9  ;;  %310 = vperm.xlu0 %877, %v276_v25   ;;  %v269_v25 = vld [vmem:[%s1104_s2 + $0x68] sm:$0xff] }
  0x12   :  { %315 = vperm.xlu1 %878, %v277_v26   ;;  %v270_v26 = vld [vmem:[%s1104_s2 + $0x70] sm:$0xff] }
  0x14   :  { %705 = vmatmul.mubr.msk.f32.gmra.mrb[6].mxu0 %vm42_vm1, %v31_v10 }
  0x15   :  { %707 = vmatprep.mubr.msk.f32.mxu0 %vm42_vm1, %v32_v11  ;;  %320 = vperm.xlu0 %877, %v278_v27   ;;  %v271_v27 = vld [vmem:[%s1104_s2 + $0x78] sm:$0xff] }
  0x16   :  { %325 = vperm.xlu1 %878, %v279_v28   ;;  %v881_v28 = vmov 0.0|0.0  }
  0x17   :  { %848 = vmatprep.subr.bf16.mxu0 %v881_v28 }
  0x18   :  { %708 = vmatmul.mubr.msk.f32.gmra.mrb[8].mxu0 %vm42_vm1, %v33_v12 }
  0x19   :  { %710 = vmatprep.mubr.msk.f32.mxu0 %vm42_vm1, %v34_v13  ;;  %330 = vperm.xlu0 %877, %v280_v29   ;;  %v257_v13 = vld [vmem:[%s1104_s2 + $0x8] sm:$0xff]  ;;  %v883_v29 = vmov 0.0  }
  0x1a   :  { %335 = vperm.xlu1 %878, %v281_v30  }
  0x1c   :  { %711 = vmatmul.mubr.msk.f32.gmra.mrb[10].mxu0 %vm42_vm1, %v35_v14  ;;  %v258_v14 = vld [vmem:[%s1104_s2 + $0x10] sm:$0xff] }
  0x1d   :  { %713 = vmatprep.mubr.msk.f32.mxu0 %vm42_vm1, %v36_v15  ;;  %340 = vperm.xlu0 %877, %v282_v31   ;;  %v259_v15 = vld [vmem:[%s1104_s2 + $0x18] sm:$0xff] }
  0x1e   :  { %345 = vperm.xlu1 %878, %v283_v32  }
  0x20   :  { %714 = vmatmul.mubr.msk.f32.gmra.mrb[12].mxu0 %vm42_vm1, %v37_v16  ;;  %v260_v16 = vld [vmem:[%s1104_s2 + $0x20] sm:$0xff] }
  0x21   :  { %716 = vmatprep.mubr.msk.f32.mxu0 %vm42_vm1, %v38_v17  ;;  %350 = vperm.xlu0 %877, %v284_v33   ;;  %v261_v17 = vld [vmem:[%s1104_s2 + $0x28] sm:$0xff] }
  0x22   :  { %355 = vperm.xlu1 %878, %v285_v34  }
  0x24   :  { %717 = vmatmul.mubr.msk.f32.gmra.mrb[14].mxu0 %vm42_vm1, %v39_v18  ;;  %v262_v18 = vld [vmem:[%s1104_s2 + $0x30] sm:$0xff] }
  0x25   :  { %360 = vperm.xlu0 %877, %v286_v35   ;;  %807 = vmatprep.mubr.msk.f32.mxu0 %vm882_vm4, %v883_v29 }
  0x26   :  { %365 = vperm.xlu1 %878, %v287_v36  }
  0x88   :  { %v291_v31 = vpop.permute.xlu0 %290 }
  0x89   :  { %v301_v30 = vpop.permute.xlu1 %300 }
  0x8c   :  { %v296_v33 = vpop.permute.xlu0 %295 }
  0x8d   :  { %v306_v32 = vpop.permute.xlu1 %305 }
  0x90   :  { %v311_v35 = vpop.permute.xlu0 %310 }
  0x91   :  { %v316_v34 = vpop.permute.xlu1 %315 }
  0xdb   :  { %v697_v37 = vpop.f32.mrb[0].mxu0 }
  0xdc   :  { %v241_v38 = vmax.f32 %v697_v37, 0.0  ;;  %v161_v39 = vpop.f32.mrb[1].mxu0 }
  0xdd   :  { %v240_v40 = vmax.f32 %v161_v39, 0.0 }
  0xdf   :  { %v700_v41 = vpop.f32.mrb[2].mxu0  ;;  %v816_v42 = vpack.c.bf16 %v241_v38, %v240_v40 }
  0xe0   :  { %v243_v43 = vmax.f32 %v700_v41, 0.0  ;;  %v171_v44 = vpop.f32.mrb[3].mxu0  ;;  %v326_v41 = vpop.permute.xlu1 %325 }
  0xe1   :  { %v242_v45 = vmax.f32 %v171_v44, 0.0  ;;  %817 = vmatprep.subr.bf16.mxu1 %v816_v42  ;;  %v321_v44 = vpop.permute.xlu0 %320 }
  0xe2   :  { %819 = vmatpush3.bf16.msra.mxu1 %v816_v42 }
  0xe3   :  { %v820_v46 = vpack.c.bf16 %v243_v43, %v242_v45  ;;  %v703_v47 = vpop.f32.mrb[4].mxu0 }
  0xe4   :  { %v245_v48 = vmax.f32 %v703_v47, 0.0  ;;  %v181_v49 = vpop.f32.mrb[5].mxu0 }
  0xe5   :  { %v244_v50 = vmax.f32 %v181_v49, 0.0  ;;  %821 = vmatprep.subr.bf16.mxu1 %v820_v46 }
  0xe6   :  { %823 = vmatpush3.bf16.msra.mxu1 %v820_v46 }
  0xe7   :  { %v824_v51 = vpack.c.bf16 %v245_v48, %v244_v50  ;;  %v706_v52 = vpop.f32.mrb[6].mxu0 }
  0xe8   :  { %v247_v53 = vmax.f32 %v706_v52, 0.0  ;;  %v191_v54 = vpop.f32.mrb[7].mxu0 }
  0xe9   :  { %v246_v55 = vmax.f32 %v191_v54, 0.0  ;;  %825 = vmatprep.subr.bf16.mxu1 %v824_v51  ;;  %v336_v54 = vpop.permute.xlu1 %335 }
  0xea   :  { %827 = vmatpush3.bf16.msra.mxu1 %v824_v51 }
  0xeb   :  { %v828_v56 = vpack.c.bf16 %v247_v53, %v246_v55  ;;  %v709_v57 = vpop.f32.mrb[8].mxu0 }
  0xec   :  { %v249_v58 = vmax.f32 %v709_v57, 0.0  ;;  %v201_v59 = vpop.f32.mrb[9].mxu0  ;;  %v331_v57 = vpop.permute.xlu0 %330 }
  0xed   :  { %v248_v60 = vmax.f32 %v201_v59, 0.0  ;;  %829 = vmatprep.subr.bf16.mxu1 %v828_v56 }
  0xee   :  { %831 = vmatpush3.bf16.msra.mxu1 %v828_v56 }
  0xef   :  { %v832_v61 = vpack.c.bf16 %v249_v58, %v248_v60  ;;  %v712_v62 = vpop.f32.mrb[10].mxu0 }
  0xf0   :  { %v251_v63 = vmax.f32 %v712_v62, 0.0  ;;  %v211_v0 = vpop.f32.mrb[11].mxu0 }
  0xf1   :  { %v250_v1 = vmax.f32 %v211_v0, 0.0  ;;  %833 = vmatprep.subr.bf16.mxu1 %v832_v61 }
  0xf2   :  { %835 = vmatpush3.bf16.msra.mxu1 %v832_v61 }
  0xf3   :  { %v836_v2 = vpack.c.bf16 %v251_v63, %v250_v1  ;;  %v715_v3 = vpop.f32.mrb[12].mxu0 }
  0xf4   :  { %v253_v4 = vmax.f32 %v715_v3, 0.0  ;;  %v221_v5 = vpop.f32.mrb[13].mxu0 }
  0xf5   :  { %v252_v6 = vmax.f32 %v221_v5, 0.0  ;;  %837 = vmatprep.subr.bf16.mxu1 %v836_v2  ;;  %v341_v5 = vpop.permute.xlu0 %340 }
  0xf6   :  { %839 = vmatpush3.bf16.msra.mxu1 %v836_v2  ;;  %v346_v2 = vpop.permute.xlu1 %345 }
  0xf7   :  { %v840_v7 = vpack.c.bf16 %v253_v4, %v252_v6  ;;  %v718_v8 = vpop.f32.mrb[14].mxu0 }
  0xf8   :  { %v255_v9 = vmax.f32 %v718_v8, 0.0  ;;  %v231_v10 = vpop.f32.mrb[15].mxu0 }
  0xf9   :  { %v254_v11 = vmax.f32 %v231_v10, 0.0  ;;  %841 = vmatprep.subr.bf16.mxu1 %v840_v7 }
  0xfa   :  { %843 = vmatpush3.bf16.msra.mxu1 %v840_v7 }
  0xfb   :  { %v844_v12 = vpack.c.bf16 %v255_v9, %v254_v11 }
  0xfd   :  { %845 = vmatprep.subr.bf16.mxu1 %v844_v12 }
  0xfe   :  { %847 = vmatpush3.bf16.msra.mxu1 %v844_v12 }
 0x101   :  { %752 = vmatmul.mubr.f32.vlgmr.msra.gmra.mrb[0].mxu1 %v257_v13 }
 0x102   :  { %754 = vmatprep.mubr.f32.mxu1 %v258_v14 }
 0x105   :  { %755 = vmatmul.mubr.f32.gmra.mrb[2].mxu1 %v259_v15  ;;  %v356_v15 = vpop.permute.xlu1 %355 }
 0x106   :  { %757 = vmatprep.mubr.f32.mxu1 %v260_v16 }
 0x109   :  { %758 = vmatmul.mubr.f32.gmra.mrb[4].mxu1 %v261_v17 }
 0x10a   :  { %760 = vmatprep.mubr.f32.mxu1 %v262_v18  ;;  %v351_v18 = vpop.permute.xlu0 %350 }
 0x10d   :  { %761 = vmatmul.mubr.f32.gmra.mrb[6].mxu1 %v263_v19 }
 0x10e   :  { %763 = vmatprep.mubr.f32.mxu1 %v264_v20 }
 0x111   :  { %764 = vmatmul.mubr.f32.gmra.mrb[8].mxu1 %v265_v21 }
 0x112   :  { %766 = vmatprep.mubr.f32.mxu1 %v266_v22 }
 0x115   :  { %767 = vmatmul.mubr.f32.gmra.mrb[10].mxu1 %v267_v23 }
 0x116   :  { %769 = vmatprep.mubr.f32.mxu1 %v268_v24 }
 0x119   :  { %770 = vmatmul.mubr.f32.gmra.mrb[12].mxu1 %v269_v25 }
 0x11a   :  { %772 = vmatprep.mubr.f32.mxu1 %v270_v26 }
 0x11d   :  { %773 = vmatmul.mubr.f32.gmra.mrb[14].mxu1 %v271_v27  ;;  %v366_v27 = vpop.permute.xlu1 %365 }
 0x1d4   :  { %v753_v36 = vpop.f32.mrb[0].mxu1 }
 0x1d5   :  { %v440_v37 = vadd.f32 %v753_v36, %v296_v33  ;;  %v434_v38 = vpop.f32.mrb[1].mxu1 }
 0x1d6   :  { %v435_v39 = vadd.f32 %v434_v38, %v291_v31  ;;  %v361_v31 = vpop.permute.xlu0 %360 }
 0x1d7   :  { %v514_v40 = vmax.f32 %v440_v37, 0.0 }
 0x1d8   :  { %v513_v42 = vmax.f32 %v435_v39, 0.0  ;;  %v756_v43 = vpop.f32.mrb[2].mxu1  ;;  %v529_v39 = vld [vmem:[%s1106_s4] sm:$0x1] }
 0x1d9   :  { %v450_v45 = vadd.f32 %v756_v43, %v306_v32  ;;  %v444_v46 = vpop.f32.mrb[3].mxu1 }
 0x1da   :  { %v849_v47 = vpack.c.bf16 %v514_v40, %v513_v42  ;;  %v445_v48 = vadd.f32 %v444_v46, %v301_v30  ;;  %v531_v40 = vstv %s1107_s5 }
 0x1db   :  { %v516_v49 = vmax.f32 %v450_v45, 0.0 }
 0x1dc   :  { %v515_v50 = vmax.f32 %v445_v48, 0.0  ;;  %v759_v51 = vpop.f32.mrb[4].mxu1  ;;  %850 = vmatpush3.bf16.msra.mxu0 %v849_v47 }
 0x1dd   :  { %v460_v52 = vadd.f32 %v759_v51, %v316_v34  ;;  %v454_v53 = vpop.f32.mrb[5].mxu1  ;;  %851 = vmatprep.subr.bf16.mxu0 %v881_v28 }
 0x1de   :  { %v852_v55 = vpack.c.bf16 %v516_v49, %v515_v50  ;;  %v455_v56 = vadd.f32 %v454_v53, %v311_v35 }
 0x1df   :  { %v518_v58 = vmax.f32 %v460_v52, 0.0 }
 0x1e0   :  { %v517_v59 = vmax.f32 %v455_v56, 0.0  ;;  %v762_v60 = vpop.f32.mrb[6].mxu1  ;;  %853 = vmatpush3.bf16.msra.mxu0 %v852_v55 }
 0x1e1   :  { %v470_v61 = vadd.f32 %v762_v60, %v326_v41  ;;  %v464_v62 = vpop.f32.mrb[7].mxu1  ;;  %854 = vmatprep.subr.bf16.mxu0 %v881_v28 }
 0x1e2   :  { %v855_v63 = vpack.c.bf16 %v518_v58, %v517_v59  ;;  %v465_v0 = vadd.f32 %v464_v62, %v321_v44 }
 0x1e3   :  { %v520_v1 = vmax.f32 %v470_v61, 0.0 }
 0x1e4   :  { %v519_v3 = vmax.f32 %v465_v0, 0.0  ;;  %v765_v4 = vpop.f32.mrb[8].mxu1  ;;  %856 = vmatpush3.bf16.msra.mxu0 %v855_v63 }
 0x1e5   :  { %v480_v6 = vadd.f32 %v765_v4, %v336_v54  ;;  %v474_v7 = vpop.f32.mrb[9].mxu1  ;;  %857 = vmatprep.subr.bf16.mxu0 %v881_v28 }
 0x1e6   :  { %v858_v8 = vpack.c.bf16 %v520_v1, %v519_v3  ;;  %v475_v9 = vadd.f32 %v474_v7, %v331_v57 }
 0x1e7   :  { %v522_v10 = vmax.f32 %v480_v6, 0.0 }
 0x1e8   :  { %v521_v11 = vmax.f32 %v475_v9, 0.0  ;;  %v768_v12 = vpop.f32.mrb[10].mxu1  ;;  %859 = vmatpush3.bf16.msra.mxu0 %v858_v8 }
 0x1e9   :  { %v490_v13 = vadd.f32 %v768_v12, %v346_v2  ;;  %v484_v14 = vpop.f32.mrb[11].mxu1  ;;  %860 = vmatprep.subr.bf16.mxu0 %v881_v28 }
 0x1ea   :  { %v861_v16 = vpack.c.bf16 %v522_v10, %v521_v11  ;;  %v485_v17 = vadd.f32 %v484_v14, %v341_v5 }
 0x1eb   :  { %v524_v19 = vmax.f32 %v490_v13, 0.0 }
 0x1ec   :  { %v523_v20 = vmax.f32 %v485_v17, 0.0  ;;  %v771_v21 = vpop.f32.mrb[12].mxu1  ;;  %862 = vmatpush3.bf16.msra.mxu0 %v861_v16 }
 0x1ed   :  { %v500_v22 = vadd.f32 %v771_v21, %v356_v15  ;;  %v494_v23 = vpop.f32.mrb[13].mxu1  ;;  %863 = vmatprep.subr.bf16.mxu0 %v881_v28 }
 0x1ee   :  { %v864_v24 = vpack.c.bf16 %v524_v19, %v523_v20  ;;  %v495_v25 = vadd.f32 %v494_v23, %v351_v18 }
 0x1ef   :  { %v526_v26 = vmax.f32 %v500_v22, 0.0 }
 0x1f0   :  { %v525_v29 = vmax.f32 %v495_v25, 0.0  ;;  %v774_v30 = vpop.f32.mrb[14].mxu1  ;;  %865 = vmatpush3.bf16.msra.mxu0 %v864_v24 }
 0x1f1   :  { %v510_v32 = vadd.f32 %v774_v30, %v366_v27  ;;  %v504_v33 = vpop.f32.mrb[15].mxu1  ;;  %866 = vmatprep.subr.bf16.mxu0 %v881_v28 }
 0x1f2   :  { %v867_v34 = vpack.c.bf16 %v526_v26, %v525_v29  ;;  %v505_v35 = vadd.f32 %v504_v33, %v361_v31 }
 0x1f3   :  { %v528_v36 = vmax.f32 %v510_v32, 0.0 }
 0x1f4   :  { %v527_v37 = vmax.f32 %v505_v35, 0.0  ;;  %868 = vmatpush3.bf16.msra.mxu0 %v867_v34 }
 0x1f5   :  { %869 = vmatprep.subr.bf16.mxu0 %v881_v28 }
 0x1f6   :  { %v870_v38 = vpack.c.bf16 %v528_v36, %v527_v37 }
 0x1f8   :  { %871 = vmatpush3.bf16.msra.mxu0 %v870_v38 }
 0x1fb   :  { %808 = vmatmul.mubr.f32.vlgmr.msra.gmra.mrb[16].mxu0 %v529_v39 }
 0x2ce   :  { %v598_v41 = vpop.f32.mrb[16].mxu0 }
 0x2cf   :  { %v599_v42 = vadd.f32 %v598_v41, %v531_v40  ;;  %v809_v43 = vpop.f32.mrb[17].mxu0 }
 0x2d1   :  { %602 = vst [vmem:[%s1108_s6] sm:$0x1] %v599_v42 }

</bundles_post_ra>
